<compile_context>
chip_gen: v7x
topology: tpu7x:2x2x1
jax: 0.10.0
libtpu: 0.0.40
codegen_flags: <defaults>
</compile_context>

<pallas_src>
import jax
import jax.numpy as jnp
from jax.experimental import pallas as pl
from jax.experimental.pallas import tpu as pltpu

HIDDEN_PAD = 128  # hidden dim 100 padded to native lane width


def _round_up(x, m):
    return ((x + m - 1) // m) * m


def critic_kernel(sT_ref, aT_ref, w1s_ref, w1a_ref, b1_ref, w2_ref, b2_ref, o_ref):
    # sT_ref:  [ds, TB]      aT_ref: [da, TB]
    # w1s_ref: [128, ds]     w1a_ref: [128, da] (da == 1)
    # b1_ref:  [128, 1]      w2_ref: [128, 1]    b2_ref: [1, 1]
    # o_ref:   [1, TB]
    # layer1 (fused concat): MXU for the state part, broadcast mul for the
    # single action feature (K=1 outer product stays on the VPU).
    h = jnp.dot(w1s_ref[...], sT_ref[...], preferred_element_type=jnp.float32)
    h = h + w1a_ref[...] * aT_ref[...]          # [128,1]*[1,TB] -> [128,TB]
    h = h + b1_ref[...]                          # lane-broadcast bias
    h = jnp.maximum(h, 0.0)                      # ReLU on f32 accumulator
    # layer2 as VPU multiply + cross-sublane reduce (avoids N=1 MXU matmul).
    y = jnp.sum(h * w2_ref[...], axis=0, keepdims=True) + b2_ref[...]  # [1,TB]
    o_ref[...] = y.astype(o_ref.dtype)


def pack_params(params):
    """PyTorch-layout params -> kernel-layout, hidden padded to 128."""
    w1, b1, w2, b2 = params  # [100,4], [100], [1,100], [1]
    hid, din = w1.shape
    w1p = jnp.zeros((HIDDEN_PAD, din), jnp.float32).at[:hid, :].set(w1)
    b1p = jnp.zeros((HIDDEN_PAD, 1), jnp.float32).at[:hid, 0].set(b1)
    w2p = jnp.zeros((HIDDEN_PAD, 1), jnp.float32).at[:hid, 0].set(w2[0])
    b2p = b2.reshape(1, 1).astype(jnp.float32)
    return w1p, b1p, w2p, b2p


def critic_forward(s, a, params, *, tb_max=2048):
    """s: [B, ds], a: [B, da] with ds + da == 4. Returns [B, 1]."""
    B, ds = s.shape
    da = a.shape[1]
    w1p, b1p, w2p, b2p = pack_params(params)
    assert ds + da == w1p.shape[1]
    w1s = w1p[:, :ds]       # [128, ds]
    w1a = w1p[:, ds:]       # [128, da]

    # Batch tile on the lane axis: multiple of 128, large enough to amortize
    # per-step overhead, small enough for v7x's 64 MiB VMEM.
    TB = min(tb_max, _round_up(B, 128))
    B_pad = _round_up(B, TB)

    # Transposed, zero-padded activations (layout plumbing in the wrapper;
    # padded columns produce garbage that is sliced away below).
    sT = jnp.zeros((ds, B_pad), jnp.float32).at[:, :B].set(s.T)
    aT = jnp.zeros((da, B_pad), jnp.float32).at[:, :B].set(a.T)

    const = lambda shape: pl.BlockSpec(shape, lambda i: (0, 0))
    batch = lambda rows: pl.BlockSpec((rows, TB), lambda i: (0, i))

    cost = pl.CostEstimate(
        flops=2 * B_pad * HIDDEN_PAD * (ds + da) + 2 * B_pad * HIDDEN_PAD,
        transcendentals=0,
        bytes_accessed=4 * (B_pad * (ds + da + 1)
                            + HIDDEN_PAD * (ds + da + 2) + 1),
    )

    yT = pl.pallas_call(
        critic_kernel,
        out_shape=jax.ShapeDtypeStruct((1, B_pad), jnp.float32),
        grid=(B_pad // TB,),
        in_specs=[
            batch(ds),                 # s^T
            batch(da),                 # a^T
            const((HIDDEN_PAD, ds)),   # W1 (state slice), resident
            const((HIDDEN_PAD, da)),   # W1 (action slice), resident
            const((HIDDEN_PAD, 1)),    # b1
            const((HIDDEN_PAD, 1)),    # w2
            const((1, 1)),             # b2
        ],
        out_specs=batch(1),
        compiler_params=pltpu.CompilerParams(
            dimension_semantics=("parallel",),
        ),
        cost_estimate=cost,
    )(sT, aT, w1s, w1a, b1p, w2p, b2p)

    return yT[0, :B].reshape(B, 1)


def init_params(key):
    """nn.Linear-style init, PyTorch layout: W [out,in], b [out]."""
    k1, k2, k3, k4 = jax.random.split(key, 4)
    bound1 = 1.0 / jnp.sqrt(4.0)
    bound2 = 1.0 / jnp.sqrt(100.0)
    w1 = jax.random.uniform(k1, (100, 4), jnp.float32, -bound1, bound1)
    b1 = jax.random.uniform(k2, (100,), jnp.float32, -bound1, bound1)
    w2 = jax.random.uniform(k3, (1, 100), jnp.float32, -bound2, bound2)
    b2 = jax.random.uniform(k4, (1,), jnp.float32, -bound2, bound2)
    return w1, b1, w2, b2


def critic_ref(s, a, params):
    """Pure-JAX reference matching the PyTorch forward."""
    w1, b1, w2, b2 = params
    x = jnp.concatenate([s, a], axis=1)
    h = jnp.maximum(x @ w1.T + b1, 0.0)
    return h @ w2.T + b2


if __name__ == "__main__":
    key = jax.random.PRNGKey(0)
    kp, ks, ka = jax.random.split(key, 3)
    params = init_params(kp)

    B = 8
    s = jax.random.normal(ks, (B, 3), jnp.float32)   # state
    a = jax.random.normal(ka, (B, 1), jnp.float32)   # action

    out = critic_forward(s, a, params)
    out = jax.block_until_ready(out)

    ref = critic_ref(s, a, params)
    assert out.shape == (B, 1)
    assert jnp.allclose(out, ref, atol=1e-5, rtol=1e-5), "mismatch vs reference"
    print("KERNEL_OK")
</pallas_src>

<mosaic_0001>
module attributes {stable_mosaic.version = 11 : i64} {
  func.func @critic_kernel(%arg0: i32, %arg1: memref<3x128xf32, #tpu.memory_space<vmem>>, %arg2: memref<1x128xf32, #tpu.memory_space<vmem>>, %arg3: memref<128x3xf32, #tpu.memory_space<vmem>>, %arg4: memref<128x1xf32, #tpu.memory_space<vmem>>, %arg5: memref<128x1xf32, #tpu.memory_space<vmem>>, %arg6: memref<128x1xf32, #tpu.memory_space<vmem>>, %arg7: memref<1x1xf32, #tpu.memory_space<vmem>>, %arg8: memref<1x128xf32, #tpu.memory_space<vmem>>) attributes {dimension_semantics = [#tpu.dimension_semantics<parallel>], iteration_bounds = array<i64: 1>, scalar_prefetch = 0 : i64, scratch_operands = 0 : i64, tpu.core_type = #tpu.core_type<tc>, window_params = [{transform_indices = @transform_0, window_bounds = array<i64: 3, 128>}, {transform_indices = @transform_1, window_bounds = array<i64: 1, 128>}, {pipeline_mode = #tpu.pipeline_mode<synchronous>, transform_indices = @transform_2, window_bounds = array<i64: 128, 3>}, {pipeline_mode = #tpu.pipeline_mode<synchronous>, transform_indices = @transform_3, window_bounds = array<i64: 128, 1>}, {pipeline_mode = #tpu.pipeline_mode<synchronous>, transform_indices = @transform_4, window_bounds = array<i64: 128, 1>}, {pipeline_mode = #tpu.pipeline_mode<synchronous>, transform_indices = @transform_5, window_bounds = array<i64: 128, 1>}, {pipeline_mode = #tpu.pipeline_mode<synchronous>, transform_indices = @transform_6, window_bounds = array<i64: 1, 1>}, {transform_indices = @transform_7, window_bounds = array<i64: 1, 128>}]} {
    %c0 = arith.constant 0 : index
    %c0_0 = arith.constant 0 : index
    %0 = vector.load %arg3[%c0, %c0_0] : memref<128x3xf32, #tpu.memory_space<vmem>>, vector<128x3xf32>
    %c0_1 = arith.constant 0 : index
    %c0_2 = arith.constant 0 : index
    %1 = vector.load %arg1[%c0_1, %c0_2] : memref<3x128xf32, #tpu.memory_space<vmem>>, vector<3x128xf32>
    %cst = arith.constant dense<0.000000e+00> : vector<128x128xf32>
    %2 = tpu.matmul %0, %1, %cst {dimension_numbers = #tpu.dot_dimension_numbers<[1], [0], [0], [1], [0, 0, 1, 1], [], []>} : vector<128x3xf32>, vector<3x128xf32>, vector<128x128xf32> -> vector<128x128xf32>
    %c0_3 = arith.constant 0 : index
    %c0_4 = arith.constant 0 : index
    %3 = vector.load %arg4[%c0_3, %c0_4] : memref<128x1xf32, #tpu.memory_space<vmem>>, vector<128x1xf32>
    %c0_5 = arith.constant 0 : index
    %c0_6 = arith.constant 0 : index
    %4 = vector.load %arg2[%c0_5, %c0_6] : memref<1x128xf32, #tpu.memory_space<vmem>>, vector<1x128xf32>
    %5 = vector.broadcast %3 : vector<128x1xf32> to vector<128x128xf32>
    %6 = vector.broadcast %4 : vector<1x128xf32> to vector<128x128xf32>
    %7 = arith.mulf %5, %6 : vector<128x128xf32>
    %8 = arith.addf %2, %7 : vector<128x128xf32>
    %c0_7 = arith.constant 0 : index
    %c0_8 = arith.constant 0 : index
    %9 = vector.load %arg5[%c0_7, %c0_8] : memref<128x1xf32, #tpu.memory_space<vmem>>, vector<128x1xf32>
    %10 = vector.broadcast %9 : vector<128x1xf32> to vector<128x128xf32>
    %11 = arith.addf %8, %10 : vector<128x128xf32>
    %cst_9 = arith.constant 0.000000e+00 : f32
    %12 = vector.broadcast %cst_9 : f32 to vector<128x128xf32>
    %13 = arith.maximumf %11, %12 : vector<128x128xf32>
    %c0_10 = arith.constant 0 : index
    %c0_11 = arith.constant 0 : index
    %14 = vector.load %arg6[%c0_10, %c0_11] : memref<128x1xf32, #tpu.memory_space<vmem>>, vector<128x1xf32>
    %15 = vector.broadcast %14 : vector<128x1xf32> to vector<128x128xf32>
    %16 = arith.mulf %13, %15 : vector<128x128xf32>
    %cst_12 = arith.constant dense<0.000000e+00> : vector<128xf32>
    %17 = vector.multi_reduction <add>, %16, %cst_12 [0] : vector<128x128xf32> to vector<128xf32>
    %18 = vector.shape_cast %17 : vector<128xf32> to vector<1x128xf32>
    %c0_13 = arith.constant 0 : index
    %c0_14 = arith.constant 0 : index
    %19 = vector.load %arg7[%c0_13, %c0_14] : memref<1x1xf32, #tpu.memory_space<vmem>>, vector<1x1xf32>
    %20 = vector.broadcast %19 : vector<1x1xf32> to vector<1x128xf32>
    %21 = arith.addf %18, %20 : vector<1x128xf32>
    %c0_15 = arith.constant 0 : index
    %c0_16 = arith.constant 0 : index
    %22 = vector.load %arg8[%c0_15, %c0_16] : memref<1x128xf32, #tpu.memory_space<vmem>>, vector<1x128xf32>
    tpu.vector_store %arg8[%c0_15, %c0_16], %21 {strides = array<i32>} : memref<1x128xf32, #tpu.memory_space<vmem>>, vector<1x128xf32>,
    return
  }
  func.func @transform_0(%arg0: i32) -> (i32, i32) {
    %c0_i32 = arith.constant 0 : i32
    %c0_i32_0 = arith.constant 0 : i32
    return %c0_i32, %arg0 : i32, i32
  }
  func.func @transform_1(%arg0: i32) -> (i32, i32) {
    %c0_i32 = arith.constant 0 : i32
    %c0_i32_0 = arith.constant 0 : i32
    return %c0_i32, %arg0 : i32, i32
  }
  func.func @transform_2(%arg0: i32) -> (i32, i32) {
    %c0_i32 = arith.constant 0 : i32
    %c0_i32_0 = arith.constant 0 : i32
    %c0_i32_1 = arith.constant 0 : i32
    return %c0_i32, %c0_i32_0 : i32, i32
  }
  func.func @transform_3(%arg0: i32) -> (i32, i32) {
    %c0_i32 = arith.constant 0 : i32
    %c0_i32_0 = arith.constant 0 : i32
    %c0_i32_1 = arith.constant 0 : i32
    return %c0_i32, %c0_i32_0 : i32, i32
  }
  func.func @transform_4(%arg0: i32) -> (i32, i32) {
    %c0_i32 = arith.constant 0 : i32
    %c0_i32_0 = arith.constant 0 : i32
    %c0_i32_1 = arith.constant 0 : i32
    return %c0_i32, %c0_i32_0 : i32, i32
  }
  func.func @transform_5(%arg0: i32) -> (i32, i32) {
    %c0_i32 = arith.constant 0 : i32
    %c0_i32_0 = arith.constant 0 : i32
    %c0_i32_1 = arith.constant 0 : i32
    return %c0_i32, %c0_i32_0 : i32, i32
  }
  func.func @transform_6(%arg0: i32) -> (i32, i32) {
    %c0_i32 = arith.constant 0 : i32
    %c0_i32_0 = arith.constant 0 : i32
    %c0_i32_1 = arith.constant 0 : i32
    return %c0_i32, %c0_i32_0 : i32, i32
  }
  func.func @transform_7(%arg0: i32) -> (i32, i32) {
    %c0_i32 = arith.constant 0 : i32
    %c0_i32_0 = arith.constant 0 : i32
    return %c0_i32, %arg0 : i32, i32
  }
}

</mosaic_0001>

<bundles_post_ra>
// kernel: tpu_custom_call.1
= control target key start
LH: loop header
LB: loop body
LE: loop exit
PB: predicated region body
PF: predicated region fallthrough
CT: control target
= control target key end

     0   :  { %s1100_s0 = inlined_call_operand.vmem [shape: f32[3,128], index: 0, kind: input, shape index: {}]   ;;  %s1101_s1 = inlined_call_operand.vmem [shape: f32[1,128], index: 1, kind: input, shape index: {}]   ;;  %s1102_s2 = inlined_call_operand.vmem [shape: f32[128,3], index: 2, kind: input, shape index: {}]   ;;  %s1103_s3 = inlined_call_operand.vmem [shape: f32[128,1], index: 3, kind: input, shape index: {}]   ;;  %s1104_s4 = inlined_call_operand.vmem [shape: f32[128,1], index: 4, kind: input, shape index: {}]   ;;  %s1105_s5 = inlined_call_operand.vmem [shape: f32[128,1], index: 5, kind: input, shape index: {}]   ;;  %s1106_s6 = inlined_call_operand.<no memory space> [shape: f32[1,1], index: 6, kind: input, shape index: {}]   ;;  %s1107_s7 = inlined_call_operand.hbm [shape: f32[1,128], index: 7, kind: output, shape index: {}]  }
   0x1   :  { %v12_v0 = vstv %s1106_s6 }
   0x2   :  { %13 = vst [vmem:[#allocation2] sm:$0x1] %v12_v0 }
   0x3   :  { %v45_v1 = vld [vmem:[%s1100_s0] sm:$0x7]  ;;  %vm214_vm0 = vcmask 1042432   ;;  %v48_v2 = vld [vmem:[%s1103_s3 + $0x10] sm:$0xff]  ;;  %v741_v4 = vmov 0   ;;  %vm165_vm1 = vcmask 23552  }
   0x4   :  { %v46_v3 = vld [vmem:[%s1103_s3] sm:$0xff]  ;;  %716 = vset.pattern.permute.xlu1 %v741_v4  ;;  %715 = vset.pattern.permute.xlu0 %v741_v4  ;;  %v30_v7 = vld [vmem:[%s1102_s2 + $0x8] sm:$0xff]  ;;  %v49_v9 = vld [vmem:[%s1103_s3 + $0x18] sm:$0xff] }
   0x5   :  { %685 = vmatprep.subr.msk.mxu0 %vm214_vm0, %v45_v1  ;;  %711 = vmatprep.subr.msk.mxu1 %vm214_vm0, %v45_v1  ;;  %v29_v5 = vld [vmem:[%s1102_s2] sm:$0xff]  ;;  %v38_v8 = vld [vmem:[%s1102_s2 + $0x48] sm:$0xff]  ;;  %v31_v11 = vld [vmem:[%s1102_s2 + $0x10] sm:$0xff] }
   0x6   :  { %v37_v6 = vld [vmem:[%s1102_s2 + $0x40] sm:$0xff]  ;;  %75 = vperm.xlu1 %716, %v48_v2   ;;  %65 = vperm.xlu0 %715, %v46_v3   ;;  %v47_v10 = vld [vmem:[%s1103_s3 + $0x8] sm:$0xff]  ;;  %v39_v12 = vld [vmem:[%s1102_s2 + $0x50] sm:$0xff] }
   0x7   :  { %686 = vmatpush3.msk.msra.mxu0 %vm214_vm0, %v45_v1  ;;  %712 = vmatpush3.msk.msra.mxu1 %vm214_vm0, %v45_v1  ;;  %v32_v13 = vld [vmem:[%s1102_s2 + $0x18] sm:$0xff]  ;;  %v51_v15 = vld [vmem:[%s1103_s3 + $0x28] sm:$0xff]  ;;  %v50_v16 = vld [vmem:[%s1103_s3 + $0x20] sm:$0xff] }
   0x8   :  { %687 = vmatprep.mubr.msk.f32.mxu0 %vm165_vm1, %v29_v5  ;;  %699 = vmatprep.mubr.msk.f32.mxu1 %vm165_vm1, %v37_v6  ;;  %v40_v14 = vld [vmem:[%s1102_s2 + $0x58] sm:$0xff]  ;;  %v33_v17 = vld [vmem:[%s1102_s2 + $0x20] sm:$0xff]  ;;  %v34_v19 = vld [vmem:[%s1102_s2 + $0x28] sm:$0xff] }
   0x9   :  { %688 = vmatmul.mubr.msk.f32.vlgmr.msra.gmra.mrb[0].mxu0 %vm165_vm1, %v30_v7  ;;  %700 = vmatmul.mubr.msk.f32.vlgmr.msra.gmra.mrb[0].mxu1 %vm165_vm1, %v38_v8  ;;  %v41_v18 = vld [vmem:[%s1102_s2 + $0x60] sm:$0xff]  ;;  %v42_v20 = vld [vmem:[%s1102_s2 + $0x68] sm:$0xff]  ;;  %v53_v21 = vld [vmem:[%s1103_s3 + $0x38] sm:$0xff] }
   0xa   :  { %80 = vperm.xlu1 %716, %v49_v9   ;;  %70 = vperm.xlu0 %715, %v47_v10   ;;  %v52_v22 = vld [vmem:[%s1103_s3 + $0x30] sm:$0xff]  ;;  %v36_v25 = vld [vmem:[%s1102_s2 + $0x38] sm:$0xff]  ;;  %v55_v27 = vld [vmem:[%s1103_s3 + $0x48] sm:$0xff] }
   0xb   :  { %690 = vmatprep.mubr.msk.f32.mxu0 %vm165_vm1, %v31_v11  ;;  %702 = vmatprep.mubr.msk.f32.mxu1 %vm165_vm1, %v39_v12  ;;  %v35_v23 = vld [vmem:[%s1102_s2 + $0x30] sm:$0xff]  ;;  %v44_v26 = vld [vmem:[%s1102_s2 + $0x78] sm:$0xff]  ;;  %v54_v28 = vld [vmem:[%s1103_s3 + $0x40] sm:$0xff] }
   0xc   :  { %v43_v24 = vld [vmem:[%s1102_s2 + $0x70] sm:$0xff]  ;;  %v57_v29 = vld [vmem:[%s1103_s3 + $0x58] sm:$0xff] }
   0xd   :  { %691 = vmatmul.mubr.msk.f32.gmra.mrb[2].mxu0 %vm165_vm1, %v32_v13  ;;  %703 = vmatmul.mubr.msk.f32.gmra.mrb[2].mxu1 %vm165_vm1, %v40_v14  ;;  %v56_v30 = vld [vmem:[%s1103_s3 + $0x50] sm:$0xff] }
   0xe   :  { %90 = vperm.xlu1 %716, %v51_v15   ;;  %85 = vperm.xlu0 %715, %v50_v16  }
   0xf   :  { %693 = vmatprep.mubr.msk.f32.mxu0 %vm165_vm1, %v33_v17  ;;  %705 = vmatprep.mubr.msk.f32.mxu1 %vm165_vm1, %v41_v18 }
  0x11   :  { %694 = vmatmul.mubr.msk.f32.gmra.mrb[4].mxu0 %vm165_vm1, %v34_v19  ;;  %706 = vmatmul.mubr.msk.f32.gmra.mrb[4].mxu1 %vm165_vm1, %v42_v20 }
  0x12   :  { %100 = vperm.xlu1 %716, %v53_v21   ;;  %95 = vperm.xlu0 %715, %v52_v22  }
  0x13   :  { %696 = vmatprep.mubr.msk.f32.mxu0 %vm165_vm1, %v35_v23  ;;  %708 = vmatprep.mubr.msk.f32.mxu1 %vm165_vm1, %v43_v24 }
  0x15   :  { %697 = vmatmul.mubr.msk.f32.gmra.mrb[6].mxu0 %vm165_vm1, %v36_v25  ;;  %709 = vmatmul.mubr.msk.f32.gmra.mrb[6].mxu1 %vm165_vm1, %v44_v26 }
  0x16   :  { %110 = vperm.xlu1 %716, %v55_v27   ;;  %105 = vperm.xlu0 %715, %v54_v28  }
  0x17   :  { %14 = vsyncpa [#allocation4], 0  ;;  %v59_v31 = vld [vmem:[%s1103_s3 + $0x68] sm:$0xff]  ;;  %v58_v32 = vld [vmem:[%s1103_s3 + $0x60] sm:$0xff] }
  0x18   :  { %v61_v33 = vld [vmem:[%s1103_s3 + $0x78] sm:$0xff]  ;;  %v60_v34 = vld [vmem:[%s1103_s3 + $0x70] sm:$0xff]  ;;  %v364_v35 = vld [vmem:[%s1104_s4 + $0x8] sm:$0xff] }
  0x19   :  { %v363_v36 = vld [vmem:[%s1104_s4] sm:$0xff]  ;;  %v366_v37 = vld [vmem:[%s1104_s4 + $0x18] sm:$0xff]  ;;  %v365_v38 = vld [vmem:[%s1104_s4 + $0x10] sm:$0xff] }
  0x1a   :  { %120 = vperm.xlu1 %716, %v57_v29   ;;  %115 = vperm.xlu0 %715, %v56_v30   ;;  %v491_v39 = vld [vmem:[%s1105_s5] sm:$0xff]  ;;  %v493_v41 = vld [vmem:[%s1105_s5 + $0x10] sm:$0xff]  ;;  %v492_v42 = vld [vmem:[%s1105_s5 + $0x8] sm:$0xff] }
  0x1b   :  { %v367_v40 = vld [vmem:[%s1104_s4 + $0x20] sm:$0xff]  ;;  %v494_v43 = vld [vmem:[%s1105_s5 + $0x18] sm:$0xff]  ;;  %v368_v44 = vld [vmem:[%s1104_s4 + $0x28] sm:$0xff] }
  0x1c   :  { %v495_v45 = vld [vmem:[%s1105_s5 + $0x20] sm:$0xff]  ;;  %v369_v46 = vld [vmem:[%s1104_s4 + $0x30] sm:$0xff]  ;;  %v496_v47 = vld [vmem:[%s1105_s5 + $0x28] sm:$0xff] }
  0x1d   :  { %v370_v48 = vld [vmem:[%s1104_s4 + $0x38] sm:$0xff]  ;;  %v497_v49 = vld [vmem:[%s1105_s5 + $0x30] sm:$0xff]  ;;  %v371_v50 = vld [vmem:[%s1104_s4 + $0x40] sm:$0xff] }
  0x1e   :  { %130 = vperm.xlu1 %716, %v59_v31   ;;  %125 = vperm.xlu0 %715, %v58_v32   ;;  %v498_v51 = vld [vmem:[%s1105_s5 + $0x38] sm:$0xff]  ;;  %v372_v52 = vld [vmem:[%s1104_s4 + $0x48] sm:$0xff]  ;;  %v499_v53 = vld [vmem:[%s1105_s5 + $0x40] sm:$0xff] }
  0x1f   :  { %v373_v54 = vld [vmem:[%s1104_s4 + $0x50] sm:$0xff]  ;;  %v500_v55 = vld [vmem:[%s1105_s5 + $0x48] sm:$0xff]  ;;  %v374_v56 = vld [vmem:[%s1104_s4 + $0x58] sm:$0xff] }
  0x20   :  { %v501_v57 = vld [vmem:[%s1105_s5 + $0x50] sm:$0xff]  ;;  %v375_v58 = vld [vmem:[%s1104_s4 + $0x60] sm:$0xff]  ;;  %v502_v59 = vld [vmem:[%s1105_s5 + $0x58] sm:$0xff] }
  0x21   :  { %v376_v60 = vld [vmem:[%s1104_s4 + $0x68] sm:$0xff]  ;;  %v503_v61 = vld [vmem:[%s1105_s5 + $0x60] sm:$0xff]  ;;  %v377_v62 = vld [vmem:[%s1104_s4 + $0x70] sm:$0xff] }
  0x22   :  { %140 = vperm.xlu1 %716, %v61_v33   ;;  %135 = vperm.xlu0 %715, %v60_v34   ;;  %v504_v63 = vld [vmem:[%s1105_s5 + $0x68] sm:$0xff]  ;;  %v378_v0 = vld [vmem:[%s1104_s4 + $0x78] sm:$0xff]  ;;  %v505_v2 = vld [vmem:[%s1105_s5 + $0x70] sm:$0xff] }
  0x23   :  { %v506_v1 = vld [vmem:[%s1105_s5 + $0x78] sm:$0xff]  ;;  %v624_v3 = vld [vmem:[#allocation2] sm:$0x1] }
  0x26   :  { %386 = vperm.xlu1 %716, %v364_v35   ;;  %381 = vperm.xlu0 %715, %v363_v36  }
  0x2a   :  { %396 = vperm.xlu1 %716, %v366_v37   ;;  %391 = vperm.xlu0 %715, %v365_v38   ;;  %v1040_v38 = vld [vmem:[%s1101_s1] ss:$0 sm:$0xff]  ;;  %s742_s1 = smov [#allocation3]  }
  0x2b   :  { %s642_s25 = sshll.u32 %s742_s1, 4  ;;  %s643_s25 = int_to_ptr.vmem [resolvable:$true] %s642_s25 }
  0x2c   :  { %s717_s26 = scalar_lea.vmem %s643_s25, 16  ;;  %s721_s27 = scalar_lea.vmem %s643_s25, 32 }
  0x2d   :  { %p718_p0 = scmp.ne.s32.totalorder %s643_s25, %s717_s26  ;;  %p722_p1 = scmp.lt.s32.totalorder %s643_s25, %s643_s25 }
  0x2e   :  { %509 = vperm.xlu1 %716, %v491_v39   ;;  %401 = vperm.xlu0 %715, %v367_v40   ;;  %p723_p2 = scmp.lt.s32.totalorder %s721_s27, %s717_s26 }
  0x30   :  { %p724_p3 = por %p723_p2, %p722_p1 }
  0x32   :  { %519 = vperm.xlu1 %716, %v493_v41   ;;  %514 = vperm.xlu0 %715, %v492_v42   ;;  %p725_p4 = pnand %p724_p3, %p718_p0 }
  0x36   :  { %524 = vperm.xlu1 %716, %v494_v43   ;;  %406 = vperm.xlu0 %715, %v368_v44  }
  0x3a   :  { %529 = vperm.xlu1 %716, %v495_v45   ;;  %411 = vperm.xlu0 %715, %v369_v46  }
  0x3e   :  { %534 = vperm.xlu1 %716, %v496_v47   ;;  %416 = vperm.xlu0 %715, %v370_v48  }
  0x42   :  { %539 = vperm.xlu1 %716, %v497_v49   ;;  %421 = vperm.xlu0 %715, %v371_v50  }
  0x46   :  { %544 = vperm.xlu1 %716, %v498_v51   ;;  %426 = vperm.xlu0 %715, %v372_v52  }
  0x4a   :  { %549 = vperm.xlu1 %716, %v499_v53   ;;  %431 = vperm.xlu0 %715, %v373_v54  }
  0x4e   :  { %554 = vperm.xlu1 %716, %v500_v55   ;;  %436 = vperm.xlu0 %715, %v374_v56  }
  0x52   :  { %559 = vperm.xlu1 %716, %v501_v57   ;;  %441 = vperm.xlu0 %715, %v375_v58  }
  0x56   :  { %564 = vperm.xlu1 %716, %v502_v59   ;;  %446 = vperm.xlu0 %715, %v376_v60  }
  0x5a   :  { %569 = vperm.xlu1 %716, %v503_v61   ;;  %451 = vperm.xlu0 %715, %v377_v62  }
  0x5e   :  { %574 = vperm.xlu1 %716, %v504_v63   ;;  %456 = vperm.xlu0 %715, %v378_v0  }
  0x62   :  { %584 = vperm.xlu1 %716, %v506_v1   ;;  %579 = vperm.xlu0 %715, %v505_v2  }
  0x66   :  { %627 = vperm.xlu0 %715, %v624_v3  }
  0x85   :  { %v76_v4 = vpop.permute.xlu1 %75  ;;  %v66_v5 = vpop.permute.xlu0 %65 }
  0x86   :  { %v149_v42 = vmul.f32 %v1040_v38, %v66_v5  ;;  %v151_v52 = vmul.f32 %v1040_v38, %v76_v4 }
  0x89   :  { %v81_v6 = vpop.permute.xlu1 %80  ;;  %v71_v7 = vpop.permute.xlu0 %70 }
  0x8a   :  { %v150_v40 = vmul.f32 %v1040_v38, %v71_v7  ;;  %v152_v49 = vmul.f32 %v1040_v38, %v81_v6 }
  0x8d   :  { %v91_v8 = vpop.permute.xlu1 %90  ;;  %v86_v9 = vpop.permute.xlu0 %85 }
  0x8e   :  { %v154_v62 = vmul.f32 %v1040_v38, %v91_v8  ;;  %v153_v2 = vmul.f32 %v1040_v38, %v86_v9 }
  0x91   :  { %v1001_v10 = vpop.permute.xlu1 %100  ;;  %v1003_v11 = vpop.permute.xlu0 %95 }
  0x92   :  { %v156_v8 = vmul.f32 %v1040_v38, %v1001_v10 }
  0x95   :  { %v1005_v12 = vpop.permute.xlu1 %110  ;;  %v106_v13 = vpop.permute.xlu0 %105 }
  0x96   :  { %v157_v7 = vmul.f32 %v1040_v38, %v106_v13 }
  0x99   :  { %v1007_v14 = vpop.permute.xlu1 %120  ;;  %v1009_v15 = vpop.permute.xlu0 %115 }
  0x9d   :  { %v1011_v16 = vpop.permute.xlu1 %130  ;;  %v1013_v17 = vpop.permute.xlu0 %125 }
  0xa1   :  { %v1015_v18 = vpop.permute.xlu1 %140  ;;  %v1017_v19 = vpop.permute.xlu0 %135 }
  0xa5   :  { %v387_v20 = vpop.permute.xlu1 %386  ;;  %v382_v21 = vpop.permute.xlu0 %381 }
  0xa9   :  { %v392_v22 = vpop.permute.xlu0 %391  ;;  %v397_v23 = vpop.permute.xlu1 %396 }
  0xad   :  { %v402_v24 = vpop.permute.xlu0 %401  ;;  %v510_v25 = vpop.permute.xlu1 %509 }
  0xb1   :  { %v515_v26 = vpop.permute.xlu0 %514  ;;  %v520_v27 = vpop.permute.xlu1 %519 }
  0xb5   :  { %v407_v28 = vpop.permute.xlu0 %406  ;;  %v1019_v29 = vpop.permute.xlu1 %524 }
  0xb9   :  { %v1021_v30 = vpop.permute.xlu0 %411  ;;  %v1023_v31 = vpop.permute.xlu1 %529 }
  0xbd   :  { %v1025_v32 = vpop.permute.xlu0 %416  ;;  %v1027_v33 = vpop.permute.xlu1 %534 }
  0xc1   :  { %v1029_v34 = vpop.permute.xlu0 %421  ;;  %v1031_v35 = vpop.permute.xlu1 %539 }
  0xc5   :  { %v1033_v36 = vpop.permute.xlu0 %426  ;;  %v1035_v37 = vpop.permute.xlu1 %544 }
  0xc9   :  { %v1042_v39 = vpop.permute.xlu0 %431  ;;  %v1045_v41 = vpop.permute.xlu1 %549 }
  0xcd   :  { %v1049_v50 = vpop.permute.xlu0 %436  ;;  %v1053_v63 = vpop.permute.xlu1 %554 }
  0xd1   :  { %v442_v9 = vpop.permute.xlu0 %441 }
  0xdc   :  { %v689_v43 = vpop.f32.mrb[0].mxu0  ;;  %v701_v44 = vpop.f32.mrb[0].mxu1 }
  0xdd   :  { %v290_v45 = vadd.f32 %v689_v43, %v150_v40  ;;  %v284_v46 = vpop.f32.mrb[1].mxu0  ;;  %v324_v47 = vpop.f32.mrb[1].mxu1 }
  0xde   :  { %v285_v48 = vadd.f32 %v284_v46, %v149_v42 }
  0xdf   :  { %v460_v51 = vadd.f32 %v387_v20, %v290_v45 }
  0xe0   :  { %v459_v53 = vadd.f32 %v382_v21, %v285_v48  ;;  %v692_v54 = vpop.f32.mrb[2].mxu0  ;;  %v704_v55 = vpop.f32.mrb[2].mxu1 }
  0xe1   :  { %v476_v56 = vmax.f32 %v460_v51, 0.0  ;;  %v300_v57 = vadd.f32 %v692_v54, %v152_v49  ;;  %v294_v58 = vpop.f32.mrb[3].mxu0  ;;  %v334_v59 = vpop.f32.mrb[3].mxu1  ;;  %v155_v51 = vmul.f32 %v1040_v38, %v1003_v11 }
  0xe2   :  { %v475_v60 = vmax.f32 %v459_v53, 0.0  ;;  %v295_v61 = vadd.f32 %v294_v58, %v151_v52 }
  0xe3   :  { %v588_v0 = vmul.f32 %v515_v26, %v476_v56  ;;  %v462_v1 = vadd.f32 %v397_v23, %v300_v57  ;;  %v158_v23 = vmul.f32 %v1040_v38, %v1005_v12  ;;  %v560_v57 = vpop.permute.xlu1 %559 }
  0xe4   :  { %v587_v3 = vmul.f32 %v510_v25, %v475_v60  ;;  %v461_v5 = vadd.f32 %v392_v22, %v295_v61  ;;  %v695_v4 = vpop.f32.mrb[4].mxu0  ;;  %v707_v6 = vpop.f32.mrb[4].mxu1  ;;  %v325_v22 = vadd.f32 %v324_v47, %v157_v7  ;;  %v160_v61 = vmul.f32 %v1040_v38, %v1007_v14 }
  0xe5   :  { %v310_v20 = vadd.f32 %v695_v4, %v154_v62  ;;  %v304_v21 = vpop.f32.mrb[5].mxu0  ;;  %v344_v40 = vpop.f32.mrb[5].mxu1  ;;  %v478_v43 = vmax.f32 %v462_v1, 0.0  ;;  %v330_v52 = vadd.f32 %v701_v44, %v158_v23  ;;  %v162_v14 = vmul.f32 %v1040_v38, %v1011_v16 }
  0xe6   :  { %v603_v42 = vadd.f32 %v588_v0, %v587_v3  ;;  %v477_v45 = vmax.f32 %v461_v5, 0.0  ;;  %v305_v46 = vadd.f32 %v304_v21, %v153_v2  ;;  %v467_v47 = vadd.f32 %v1029_v34, %v325_v22  ;;  %v447_v0 = vpop.permute.xlu0 %446 }
  0xe7   :  { %v464_v25 = vadd.f32 %v407_v28, %v310_v20  ;;  %v590_v10 = vmul.f32 %v1019_v29, %v478_v43  ;;  %v159_v28 = vmul.f32 %v1040_v38, %v1009_v15  ;;  %v468_v1 = vadd.f32 %v1033_v36, %v330_v52 }
  0xe8   :  { %v589_v26 = vmul.f32 %v520_v27, %v477_v45  ;;  %v463_v48 = vadd.f32 %v402_v24, %v305_v46  ;;  %v698_v49 = vpop.f32.mrb[6].mxu0  ;;  %v710_v13 = vpop.f32.mrb[6].mxu1  ;;  %v340_v3 = vadd.f32 %v704_v55, %v160_v61  ;;  %v483_v4 = vmax.f32 %v467_v47, 0.0 }
  0xe9   :  { %v320_v53 = vadd.f32 %v698_v49, %v156_v8  ;;  %v314_v54 = vpop.f32.mrb[7].mxu0  ;;  %v354_v56 = vpop.f32.mrb[7].mxu1  ;;  %v480_v60 = vmax.f32 %v464_v25, 0.0  ;;  %v335_v62 = vadd.f32 %v334_v59, %v159_v28  ;;  %v484_v20 = vmax.f32 %v468_v1, 0.0 }
  0xea   :  { %v604_v58 = vadd.f32 %v603_v42, %v589_v26  ;;  %v479_v12 = vmax.f32 %v463_v48, 0.0  ;;  %v315_v27 = vadd.f32 %v314_v54, %v155_v51  ;;  %v350_v55 = vadd.f32 %v707_v6, %v162_v14  ;;  %v452_v45 = vpop.permute.xlu0 %451 }
  0xeb   :  { %v466_v24 = vadd.f32 %v1025_v32, %v320_v53  ;;  %v592_v2 = vmul.f32 %v1027_v33, %v480_v60  ;;  %v161_v32 = vmul.f32 %v1040_v38, %v1013_v17  ;;  %v163_v33 = vmul.f32 %v1040_v38, %v1017_v19 }
  0xec   :  { %v591_v11 = vmul.f32 %v1023_v31, %v479_v12  ;;  %v605_v44 = vadd.f32 %v604_v58, %v590_v10  ;;  %v465_v29 = vadd.f32 %v1021_v30, %v315_v27  ;;  %v565_v31 = vpop.permute.xlu1 %564  ;;  %v469_v30 = vadd.f32 %v1042_v39, %v335_v62 }
  0xed   :  { %v482_v34 = vmax.f32 %v466_v24, 0.0  ;;  %v345_v59 = vadd.f32 %v344_v40, %v161_v32  ;;  %v470_v17 = vadd.f32 %v1049_v50, %v340_v3  ;;  %v164_v43 = vmul.f32 %v1040_v38, %v1015_v18 }
  0xee   :  { %v606_v15 = vadd.f32 %v605_v44, %v591_v11  ;;  %v481_v5 = vmax.f32 %v465_v29, 0.0  ;;  %v595_v16 = vmul.f32 %v1045_v41, %v483_v4  ;;  %v485_v39 = vmax.f32 %v469_v30, 0.0  ;;  %v457_v49 = vpop.permute.xlu0 %456 }
  0xef   :  { %v594_v21 = vmul.f32 %v1035_v37, %v482_v34  ;;  %v471_v40 = vadd.f32 %v442_v9, %v345_v59  ;;  %v596_v19 = vmul.f32 %v1053_v63, %v484_v20  ;;  %v486_v23 = vmax.f32 %v470_v17, 0.0 }
  0xf0   :  { %v607_v7 = vadd.f32 %v606_v15, %v592_v2  ;;  %v593_v36 = vmul.f32 %v1031_v35, %v481_v5  ;;  %v355_v35 = vadd.f32 %v354_v56, %v163_v33  ;;  %v570_v8 = vpop.permute.xlu1 %569  ;;  %v472_v25 = vadd.f32 %v447_v0, %v350_v55 }
  0xf1   :  { %v360_v50 = vadd.f32 %v710_v13, %v164_v43  ;;  %v597_v22 = vmul.f32 %v560_v57, %v485_v39  ;;  %v487_v37 = vmax.f32 %v471_v40, 0.0  ;;  %v598_v18 = vmul.f32 %v565_v31, %v486_v23 }
  0xf2   :  { %v608_v42 = vadd.f32 %v607_v7, %v593_v36  ;;  %v473_v48 = vadd.f32 %v452_v45, %v355_v35  ;;  %v488_v38 = vmax.f32 %v472_v25, 0.0  ;;  %v580_v58 = vpop.permute.xlu0 %579  ;;  %v630_v24 = vlaneseq }
  0xf3   :  { %v474_v51 = vadd.f32 %v457_v49, %v360_v50  ;;  %v599_v9 = vmul.f32 %v570_v8, %v487_v37 }
  0xf4   :  { %v609_v46 = vadd.f32 %v608_v42, %v594_v21  ;;  %v575_v52 = vpop.permute.xlu1 %574  ;;  %v489_v53 = vmax.f32 %v473_v48, 0.0  ;;  %v631_v11 = vshrl.u32 %v630_v24, 7 }
  0xf5   :  { %v600_v56 = vmul.f32 %v575_v52, %v488_v38  ;;  %v490_v10 = vmax.f32 %v474_v51, 0.0 }
  0xf6   :  { %v610_v6 = vadd.f32 %v609_v46, %v595_v16  ;;  %v601_v60 = vmul.f32 %v580_v58, %v489_v53  ;;  %v632_v62 = vsub.s32 0, %v631_v11  ;;  %v628_v0 = vpop.permute.xlu0 %627 }
  0xf8   :  { %v611_v26 = vadd.f32 %v610_v6, %v596_v19  ;;  %v585_v12 = vpop.permute.xlu1 %584  ;;  %v633_v2 = vrot.slane %v628_v0, %v632_v62 }
  0xf9   :  { %v602_v57 = vmul.f32 %v585_v12, %v490_v10 }
  0xfa   :  { %v612_v41 = vadd.f32 %v611_v26, %v597_v22 }
  0xfc   :  { %v613_v54 = vadd.f32 %v612_v41, %v598_v18 }
  0xfe   :  { %v614_v63 = vadd.f32 %v613_v54, %v599_v9 }
 0x100   :  { %v615_v13 = vadd.f32 %v614_v63, %v600_v56 }
 0x102   :  { %v616_v28 = vadd.f32 %v615_v13, %v601_v60 }
 0x104   :  { %v617_v27 = vadd.f32 %v616_v28, %v602_v57 }
 0x106   :  { %v618_v47 = vrot.slane %v617_v27, 4 }
 0x108   :  { %v619_v44 = vadd.f32 %v618_v47, %v617_v27 }
 0x10a   :  { %v620_v61 = vrot.slane %v619_v44, 2 }
 0x10c   :  { %v621_v29 = vadd.f32 %v620_v61, %v619_v44 }
 0x10e   :  { %v622_v1 = vrot.slane %v621_v29, 1 }
 0x110   :  { %v623_v15 = vadd.f32 %v622_v1, %v621_v29 }
 0x112   :  { %v634_v32 = vadd.f32 %v633_v2, %v623_v15 }
 0x114   :  { %635 = vst [vmem:[#allocation3] sm:$0x1] %v634_v32 }
 0x115   :  { %728 = shalt.err (!%p725_p4)
}
 0x116   :  { %s729_s30 = scalar_lea.hbm %s1107_s7, 16 }
 0x117   :  { %p730_p5 = scmp.ne.s32.totalorder %s1107_s7, %s729_s30  ;;  %p733_p6 = scmp.lt.u32.totalorder %s729_s30, %s1107_s7 }
 0x119   :  { %p735_p7 = pnand %p733_p6, %p730_p5 }
 0x11b   :  { %738 = shalt.err (!%p735_p7)
}
 0x11c   :  { %645 = dma.vmem_to_hbm [thread:$0]  %s643_s25, 16, %s1107_s7, [#allocation4]  }
 0x11d   :  { %739 = dma.done.wait [#allocation4], 16  }
 0x11e   :  { %740 = vsyncadd [#allocation4], 4294967280 }
 0x11f   :  { %649 = vsyncpa [#allocation4], 1 }

</bundles_post_ra>
